<compile_context>
chip_gen: v7x
topology: tpu7x:2x2x1
jax: 0.10.0
libtpu: 0.0.40
codegen_flags: <defaults>
</compile_context>

<pallas_src>
import jax
import jax.numpy as jnp
from jax.experimental import pallas as pl
from jax.experimental.pallas import tpu as pltpu

_BITS24 = 1 << 24  # dropout threshold resolution (24-bit uniform integers)


# ----------------------------------------------------------------------------
# Kernel: fused dropout-mask + scale + multiply (2D, gridless, single vreg here)
#   out = x3 * x2 * (scale if bits >= thresh else 0)
# ----------------------------------------------------------------------------
def _dropout_mul_kernel(thresh_ref, scale_ref, bits_ref, x3_ref, x2_ref, out_ref):
    keep = bits_ref[...] >= thresh_ref[0]                  # int32 compare, VPU
    m = jnp.where(keep, scale_ref[0], jnp.float32(0.0))    # 2D scale-or-zero mask
    out_ref[...] = (
        x3_ref[...].astype(jnp.float32)
        * x2_ref[...].astype(jnp.float32)
        * m
    ).astype(out_ref.dtype)


# ----------------------------------------------------------------------------
# Wrapper: y = dropout(x3, p, training) * x2
# ----------------------------------------------------------------------------
def dropout_mul(x3, x2, *, p, training, seed=0):
    assert x3.shape == x2.shape
    B, H, W = x3.shape
    out_dtype = jnp.result_type(x3.dtype, x2.dtype)

    if training and p >= 1.0:
        # Constant fold: every element is dropped -> exact zeros. No kernel,
        # no DMAs, no dispatch.
        return jnp.zeros((B, H, W), dtype=out_dtype)

    if (not training) or p == 0.0:
        # Identity dropout -> plain elementwise multiply.  For a 4-element
        # tensor a fused XLA op beats a Mosaic custom call by a wide margin,
        # and it fuses with the upstream jax.random.uniform producers.
        return (x3 * x2).astype(out_dtype)

    # 0 < p < 1, training: fused mask + scale + multiply Pallas kernel.
    rows = B * H
    x3_2d = x3.reshape(rows, W)   # lane-dense-ish 2D layout; batch dim folded
    x2_2d = x2.reshape(rows, W)

    # Random bits generated outside the kernel (portable on TPU and in
    # interpret mode; avoids pltpu.prng_seed which has no CPU lowering).
    # TODO(synk): at real sizes, generate bits per-tile inside the kernel with
    # pltpu.prng_seed/prng_random_bits and pad W to a multiple of 128 lanes.
    bits = jax.random.randint(
        jax.random.PRNGKey(seed), (rows, W), 0, _BITS24, dtype=jnp.int32)

    # Runtime scalars (SMEM) -> no recompile when p changes.
    thresh = jnp.asarray(
        [min(int(round(float(p) * _BITS24)), _BITS24 - 1)], dtype=jnp.int32)
    scale = jnp.asarray([1.0 / (1.0 - float(p))], dtype=jnp.float32)

    smem = pl.BlockSpec(memory_space=pltpu.MemorySpace.SMEM)
    vmem = pl.BlockSpec(memory_space=pltpu.MemorySpace.VMEM)

    out_2d = pl.pallas_call(
        _dropout_mul_kernel,
        out_shape=jax.ShapeDtypeStruct((rows, W), out_dtype),
        in_specs=[smem, smem, vmem, vmem, vmem],
        out_specs=vmem,
    )(thresh, scale, bits, x3_2d, x2_2d)
    return out_2d.reshape(B, H, W)


def model_forward(x1, key):
    """Equivalent of Model.forward(x1) (training mode) with deterministic RNG."""
    del x1  # unused, just like the PyTorch module
    k2, k3 = jax.random.split(key)
    x2 = jax.random.uniform(k2, (1, 2, 2), dtype=jnp.float32)  # torch.rand
    x3 = jax.random.uniform(k3, (1, 2, 2), dtype=jnp.float32)  # torch.rand
    # p=1.0 in training -> constant-folded zeros (no kernel launch).
    return dropout_mul(x3, x2, p=1.0, training=True)


if __name__ == "__main__":
    key = jax.random.PRNGKey(0)
    kx, kmodel = jax.random.split(key)

    # x1 is unused by the forward pass; give it a small plausible shape.
    x1 = jax.random.normal(kx, (2, 4, 16, 16), dtype=jnp.float32)

    # 1) Module semantics: dropout p=1.0 in training -> exact zeros,
    #    produced without launching any kernel.
    y1 = jax.block_until_ready(model_forward(x1, kmodel))
    assert y1.shape == (1, 2, 2)
    assert bool(jnp.all(y1 == 0.0))

    k2, k3 = jax.random.split(kmodel)
    x2 = jax.random.uniform(k2, (1, 2, 2), dtype=jnp.float32)
    x3 = jax.random.uniform(k3, (1, 2, 2), dtype=jnp.float32)

    # 2) Eval mode: dropout is identity -> plain fused multiply (no kernel).
    y_eval = jax.block_until_ready(dropout_mul(x3, x2, p=1.0, training=False))
    assert y_eval.shape == (1, 2, 2)
    assert bool(jnp.allclose(y_eval, x3 * x2, rtol=1e-6, atol=1e-6))

    # 3) Stochastic path (0 < p < 1): exercises the Pallas kernel.  Every
    #    output element is either 0 (dropped) or x3*x2/(1-p) (kept, rescaled).
    p = 0.5
    y_sto = jax.block_until_ready(
        dropout_mul(x3, x2, p=p, training=True, seed=123))
    assert y_sto.shape == (1, 2, 2)
    full = x3 * x2 / (1.0 - p)
    ok = jnp.logical_or(jnp.isclose(y_sto, 0.0, atol=1e-7),
                        jnp.isclose(y_sto, full, rtol=1e-5, atol=1e-6))
    assert bool(jnp.all(ok))

    print("KERNEL_OK")
</pallas_src>

<mosaic_0001>
module attributes {stable_mosaic.version = 11 : i64} {
  func.func @_dropout_mul_kernel(%arg0: memref<1xi32, #tpu.memory_space<smem>>, %arg1: memref<1xf32, #tpu.memory_space<smem>>, %arg2: memref<2x2xi32, #tpu.memory_space<vmem>>, %arg3: memref<2x2xf32, #tpu.memory_space<vmem>>, %arg4: memref<2x2xf32, #tpu.memory_space<vmem>>, %arg5: memref<2x2xf32, #tpu.memory_space<vmem>>) attributes {dimension_semantics = [], scalar_prefetch = 0 : i64, scratch_operands = 0 : i64, tpu.core_type = #tpu.core_type<tc>} {
    %c0 = arith.constant 0 : index
    %c0_0 = arith.constant 0 : index
    %0 = vector.load %arg2[%c0, %c0_0] : memref<2x2xi32, #tpu.memory_space<vmem>>, vector<2x2xi32>
    %c0_1 = arith.constant 0 : index
    %1 = memref.load %arg0[%c0_1] : memref<1xi32, #tpu.memory_space<smem>>
    %2 = vector.broadcast %1 : i32 to vector<2x2xi32>
    %3 = arith.cmpi sge, %0, %2 : vector<2x2xi32>
    %c0_2 = arith.constant 0 : index
    %4 = memref.load %arg1[%c0_2] : memref<1xf32, #tpu.memory_space<smem>>
    %cst = arith.constant 0.000000e+00 : f32
    %5 = vector.broadcast %4 : f32 to vector<2x2xf32>
    %6 = vector.broadcast %cst : f32 to vector<2x2xf32>
    %7 = arith.select %3, %5, %6 : vector<2x2xi1>, vector<2x2xf32>
    %c0_3 = arith.constant 0 : index
    %c0_4 = arith.constant 0 : index
    %8 = vector.load %arg3[%c0_3, %c0_4] : memref<2x2xf32, #tpu.memory_space<vmem>>, vector<2x2xf32>
    %c0_5 = arith.constant 0 : index
    %c0_6 = arith.constant 0 : index
    %9 = vector.load %arg4[%c0_5, %c0_6] : memref<2x2xf32, #tpu.memory_space<vmem>>, vector<2x2xf32>
    %10 = arith.mulf %8, %9 : vector<2x2xf32>
    %11 = arith.mulf %10, %7 : vector<2x2xf32>
    %c0_7 = arith.constant 0 : index
    %c0_8 = arith.constant 0 : index
    %12 = vector.load %arg5[%c0_7, %c0_8] : memref<2x2xf32, #tpu.memory_space<vmem>>, vector<2x2xf32>
    tpu.vector_store %arg5[%c0_7, %c0_8], %11 {strides = array<i32>} : memref<2x2xf32, #tpu.memory_space<vmem>>, vector<2x2xf32>,
    return
  }
}

</mosaic_0001>

<bundles_post_ra>
// kernel: tpu_custom_call.1
= control target key start
LH: loop header
LB: loop body
LE: loop exit
PB: predicated region body
PF: predicated region fallthrough
CT: control target
= control target key end

     0   :  { %s133_s0 = inlined_call_operand.<no memory space> [shape: s32[1], index: 0, kind: input, shape index: {}]   ;;  %s134_s1 = inlined_call_operand.<no memory space> [shape: f32[1], index: 1, kind: input, shape index: {}]   ;;  %s135_s2 = inlined_call_operand.vmem [shape: s32[2,2], index: 2, kind: input, shape index: {}]   ;;  %s136_s3 = inlined_call_operand.vmem [shape: f32[2,2], index: 3, kind: input, shape index: {}]   ;;  %s137_s4 = inlined_call_operand.vmem [shape: f32[2,2], index: 4, kind: input, shape index: {}]   ;;  %s138_s5 = inlined_call_operand.hbm [shape: f32[2,2], index: 5, kind: output, shape index: {}]  }
   0x1   :  { %v23_v0 = vld [vmem:[%s135_s2] sm:$0x3]  ;;  %v25_v1 = vstv %s133_s0  ;;  %v28_v2 = vstv %s134_s1 }
   0x2   :  { %v30_v3 = vld [vmem:[%s136_s3] sm:$0x3]  ;;  %vm26_vm0 = vcmp.ge.s32.totalorder %v23_v0, %v25_v1 }
   0x3   :  { %v31_v4 = vld [vmem:[%s137_s4] sm:$0x3] }
   0x4   :  { %12 = vsyncpa [#allocation5], 0  ;;  %s75_s28 = smov [#allocation4]   ;;  %v29_v5 = vsel %vm26_vm0, %v28_v2, 0.0  ;;  %v32_v6 = vmul.f32 %v31_v4, %v30_v3  ;;  %vm34_vm1 = vcmask 9216  }
   0x5   :  { %s42_s2 = sshll.u32 %s75_s28, 4  ;;  %s43_s2 = int_to_ptr.vmem [resolvable:$true] %s42_s2 }
   0x6   :  { %v33_v7 = vmul.f32 %v32_v6, %v29_v5  ;;  %s51_s0 = scalar_lea.vmem %s43_s2, 32  ;;  %p56_p1 = scmp.lt.s32.totalorder %s43_s2, %s43_s2 }
   0x7   :  { %p52_p0 = scmp.ne.s32.totalorder %s43_s2, %s51_s0  ;;  %p57_p2 = scmp.lt.s32.totalorder %s51_s0, %s51_s0 }
   0x8   :  { %35 = vst.msk [vmem:[#allocation4] sm:$0x3] %vm34_vm1, %v33_v7 }
   0x9   :  { %p58_p3 = por %p57_p2, %p56_p1 }
   0xb   :  { %p59_p4 = pnand %p58_p3, %p52_p0 }
   0xd   :  { %62 = shalt.err (!%p59_p4)
}
   0xe   :  { %s63_s4 = scalar_lea.hbm %s138_s5, 32 }
   0xf   :  { %p64_p5 = scmp.ne.s32.totalorder %s138_s5, %s63_s4  ;;  %p67_p6 = scmp.lt.u32.totalorder %s63_s4, %s138_s5 }
  0x11   :  { %p69_p7 = pnand %p67_p6, %p64_p5 }
  0x13   :  { %72 = shalt.err (!%p69_p7)
}
  0x14   :  { %45 = dma.vmem_to_hbm [thread:$0]  %s43_s2, 32, %s138_s5, [#allocation5]  }
  0x15   :  { %73 = dma.done.wait [#allocation5], 32  }
  0x16   :  { %74 = vsyncadd [#allocation5], 4294967264 }
  0x17   :  { %49 = vsyncpa [#allocation5], 1 }

</bundles_post_ra>
